<compile_context>
chip_gen: v5e
topology: v5e:2x2
jax: 0.10.0
libtpu: 0.0.40
codegen_flags: <defaults>
</compile_context>

<pallas_src>
import functools

import jax
import jax.numpy as jnp
from jax import lax
from jax.experimental import pallas as pl
from jax.experimental.pallas import tpu as pltpu


_TILE_BUDGET_BYTES = 8 << 20     # per-tile VMEM budget (pipeline double-buffers it)
_SMALL_COPY_BYTES = 512 << 10    # below this per-copy size, keep more DMAs in flight
_UNROLL_BATCH_LIMIT = 16         # above this, issue copies from a fori_loop


def _pos_emb_kernel(w_ref, o_hbm, sems, *, n_slots, unrolled):
    """Replicate one weight row-tile (resident in VMEM) to every batch slice via DMA.

    w_ref : (tm, cols) VMEM tile of the (lane-dense view of the) table.
    o_hbm : (batch, rows, cols) raw HBM ref of the output (memory_space=ANY).
    sems  : (n_slots,) DMA semaphores, one per in-flight output copy slot.
    """
    t = pl.program_id(0)
    tm, _ = w_ref.shape
    batch = o_hbm.shape[0]
    row0 = pl.multiple_of(t * tm, tm)

    def copy(b, slot):
        return pltpu.make_async_copy(
            w_ref, o_hbm.at[b, pl.ds(row0, tm), :], sems.at[slot])

    if unrolled:
        # Small static batch: fully unrolled issue/wait chain, <= n_slots in flight.
        for b in range(batch):
            if b >= n_slots:
                copy(b - n_slots, (b - n_slots) % n_slots).wait()
            copy(b, b % n_slots).start()
        for b in range(max(0, batch - n_slots), batch):
            copy(b, b % n_slots).wait()
    else:
        # Large batch: same pipelined pattern without unrolling 2*batch DMA
        # descriptors at trace time.
        def issue(b, carry):
            slot = b % n_slots

            @pl.when(b >= n_slots)
            def _():
                # wait() only needs the semaphore slot and the byte count; all
                # copies in this kernel have identical shape, so reusing the
                # current descriptor is equivalent to copy(b - n_slots, slot).
                copy(b, slot).wait()

            copy(b, slot).start()
            return carry

        lax.fori_loop(0, batch, issue, 0, unroll=2)

        def drain(b, carry):
            copy(b, b % n_slots).wait()
            return carry

        lax.fori_loop(batch - n_slots, batch, drain, 0)
    # NOTE: the final drain stays inside the same grid step on purpose — see
    # the header comment (deferring it races the input pipeline's buffer reuse).


def _lane_dense_view(weight):
    """Return a 2-D lane-dense view (w2d, rows, cols) of the table."""
    max_len, d_model = weight.shape
    if d_model % 128 == 0:
        return weight, max_len, d_model
    n_elems = max_len * d_model
    if n_elems % 128 == 0:
        rows = n_elems // 128
        return weight.reshape(rows, 128), rows, 128
    # Ragged tail smaller than a lane group: keep the natural 2-D view
    # (lane-padded VMEM tiles, still correct).
    return weight, max_len, d_model


def _pick_row_tile(rows, cols, itemsize, budget_bytes=_TILE_BUDGET_BYTES):
    """Row tile: multiple of 8 (or full `rows`), divides `rows`, ~<= budget_bytes."""
    row_bytes = cols * itemsize
    if rows * row_bytes <= budget_bytes:
        tm = rows
    elif rows % 8:
        # TODO(synk): remainder-tile path for ragged row counts over budget;
        # fall back to the full table (vmem_limit_bytes is sized to it below).
        tm = rows
    else:
        tm = max(8, min(rows, (budget_bytes // row_bytes) // 8 * 8))
        while rows % tm:
            tm -= 8
        tm = max(tm, 8)
    # Ensure the "parallel" tile axis has >= 2 steps when legal so both v7x
    # TensorCores get output-DMA work even for small tables.
    if rows // tm < 2 and rows >= 16 and rows % 8 == 0:
        tm = max(8, (rows // 2) // 8 * 8)
        while rows % tm:
            tm -= 8
    return tm


def positional_embedding(x, weight):
    """Return `weight` broadcast to (batch, max_len, d_model).

    x: any array whose leading dim is the batch size (the PyTorch forward only
       reads x.size(0)).
    weight: (max_len, d_model) embedding table.
    """
    batch = x.shape[0]
    max_len, d_model = weight.shape
    itemsize = jnp.dtype(weight.dtype).itemsize

    w2d, rows, cols = _lane_dense_view(weight)
    tm = _pick_row_tile(rows, cols, itemsize)
    num_tiles = rows // tm
    assert num_tiles * tm == rows

    tile_bytes = tm * cols * itemsize
    n_slots = min(batch, 8 if tile_bytes < _SMALL_COPY_BYTES else 4)
    unrolled = batch <= _UNROLL_BATCH_LIMIT
    # Input tile is double-buffered by the pipeline; add headroom for the
    # compiler's internal scratch.
    vmem_limit = max(16 << 20, 2 * tile_bytes + (4 << 20))

    kernel = functools.partial(_pos_emb_kernel, n_slots=n_slots, unrolled=unrolled)

    out = pl.pallas_call(
        kernel,
        out_shape=jax.ShapeDtypeStruct((batch, rows, cols), weight.dtype),
        grid_spec=pltpu.PrefetchScalarGridSpec(
            num_scalar_prefetch=0,
            grid=(num_tiles,),
            in_specs=[
                # Row tile of the (lane-dense) table, auto double-buffered HBM->VMEM.
                pl.BlockSpec((tm, cols), lambda t: (t, 0)),
            ],
            # Output stays in HBM; the kernel writes it with explicit DMAs.
            out_specs=pl.BlockSpec(memory_space=pl.ANY),
            scratch_shapes=[pltpu.SemaphoreType.DMA((n_slots,))],
        ),
        compiler_params=pltpu.CompilerParams(
            dimension_semantics=("parallel",),
            vmem_limit_bytes=int(vmem_limit),
        ),
        cost_estimate=pl.CostEstimate(
            flops=0,
            transcendentals=0,
            bytes_accessed=int((batch + 1) * max_len * d_model * itemsize),
        ),
    )(w2d)
    return out.reshape(batch, max_len, d_model)


if __name__ == "__main__":
    key = jax.random.PRNGKey(0)
    batch = 2
    max_len = 8
    d_model = 32

    k_w, k_x = jax.random.split(key)
    # Deterministic "nn.Embedding" weight (normal init, like PyTorch default).
    weight = jax.random.normal(k_w, (max_len, d_model), dtype=jnp.float32)
    # x: token-id style input (batch, seq) — forward only uses x.shape[0].
    x = jax.random.randint(k_x, (batch, max_len), 0, max_len, dtype=jnp.int32)

    out = jax.block_until_ready(positional_embedding(x, weight))

    # Reference check: plain JAX broadcast.
    ref = jnp.broadcast_to(weight[None], (batch, max_len, d_model))
    assert out.shape == (batch, max_len, d_model)
    assert out.dtype == weight.dtype
    assert jnp.array_equal(out, ref)

    print("KERNEL_OK")
</pallas_src>

<mosaic_0001>
module attributes {stable_mosaic.version = 11 : i64} {
  func.func @_pos_emb_kernel(%arg0: i32, %arg1: memref<2x128xf32, #tpu.memory_space<vmem>>, %arg2: memref<2x2x128xf32, #tpu.memory_space<any>>, %arg3: memref<2x!tpu.dma_semaphore, #tpu.memory_space<semaphore_mem>>) attributes {dimension_semantics = [#tpu.dimension_semantics<parallel>], iteration_bounds = array<i64: 1>, scalar_prefetch = 0 : i64, scratch_operands = 1 : i64, tpu.core_type = #tpu.core_type<tc>, window_params = [{transform_indices = @transform_0, window_bounds = array<i64: 2, 128>}, {}]} {
    %c2_i32 = arith.constant 2 : i32
    %0 = arith.muli %arg0, %c2_i32 : i32
    %1 = tpu.assume_multiple %0, 2 : i32
    %c0_i32 = arith.constant 0 : i32
    %c0_i32_0 = arith.constant 0 : i32
    %c0_i32_1 = arith.constant 0 : i32
    %2 = tpu.memref_slice %arg2[%c0_i32, %1, %c0_i32_1] : memref<2x2x128xf32, #tpu.memory_space<any>> -> memref<1x2x128xf32, #tpu.memory_space<any>>
    %3 = tpu.memref_squeeze %2 : memref<1x2x128xf32, #tpu.memory_space<any>> -> memref<2x128xf32, #tpu.memory_space<any>>
    %4 = tpu.memref_slice %arg3[%c0_i32_0] : memref<2x!tpu.dma_semaphore, #tpu.memory_space<semaphore_mem>> -> memref<1x!tpu.dma_semaphore, #tpu.memory_space<semaphore_mem>>
    %5 = tpu.memref_squeeze %4 : memref<1x!tpu.dma_semaphore, #tpu.memory_space<semaphore_mem>> -> memref<!tpu.dma_semaphore, #tpu.memory_space<semaphore_mem>>
    tpu.enqueue_dma source(%arg1 : memref<2x128xf32, #tpu.memory_space<vmem>>) target(%3 : memref<2x128xf32, #tpu.memory_space<any>>) target_semaphore(%5 : memref<!tpu.dma_semaphore, #tpu.memory_space<semaphore_mem>>)
    %c1_i32 = arith.constant 1 : i32
    %c1_i32_2 = arith.constant 1 : i32
    %c0_i32_3 = arith.constant 0 : i32
    %6 = tpu.memref_slice %arg2[%c1_i32, %1, %c0_i32_3] : memref<2x2x128xf32, #tpu.memory_space<any>> -> memref<1x2x128xf32, #tpu.memory_space<any>>
    %7 = tpu.memref_squeeze %6 : memref<1x2x128xf32, #tpu.memory_space<any>> -> memref<2x128xf32, #tpu.memory_space<any>>
    %8 = tpu.memref_slice %arg3[%c1_i32_2] : memref<2x!tpu.dma_semaphore, #tpu.memory_space<semaphore_mem>> -> memref<1x!tpu.dma_semaphore, #tpu.memory_space<semaphore_mem>>
    %9 = tpu.memref_squeeze %8 : memref<1x!tpu.dma_semaphore, #tpu.memory_space<semaphore_mem>> -> memref<!tpu.dma_semaphore, #tpu.memory_space<semaphore_mem>>
    tpu.enqueue_dma source(%arg1 : memref<2x128xf32, #tpu.memory_space<vmem>>) target(%7 : memref<2x128xf32, #tpu.memory_space<any>>) target_semaphore(%9 : memref<!tpu.dma_semaphore, #tpu.memory_space<semaphore_mem>>)
    %c0_i32_4 = arith.constant 0 : i32
    %c0_i32_5 = arith.constant 0 : i32
    %c0_i32_6 = arith.constant 0 : i32
    %10 = tpu.memref_slice %arg2[%c0_i32_4, %1, %c0_i32_6] : memref<2x2x128xf32, #tpu.memory_space<any>> -> memref<1x2x128xf32, #tpu.memory_space<any>>
    %11 = tpu.memref_squeeze %10 : memref<1x2x128xf32, #tpu.memory_space<any>> -> memref<2x128xf32, #tpu.memory_space<any>>
    %12 = tpu.memref_slice %arg3[%c0_i32_5] : memref<2x!tpu.dma_semaphore, #tpu.memory_space<semaphore_mem>> -> memref<1x!tpu.dma_semaphore, #tpu.memory_space<semaphore_mem>>
    %13 = tpu.memref_squeeze %12 : memref<1x!tpu.dma_semaphore, #tpu.memory_space<semaphore_mem>> -> memref<!tpu.dma_semaphore, #tpu.memory_space<semaphore_mem>>
    tpu.wait_dma2 semaphore(%13 : memref<!tpu.dma_semaphore, #tpu.memory_space<semaphore_mem>>) src(%arg1 : memref<2x128xf32, #tpu.memory_space<vmem>>) dst(%11 : memref<2x128xf32, #tpu.memory_space<any>>)
    %c1_i32_7 = arith.constant 1 : i32
    %c1_i32_8 = arith.constant 1 : i32
    %c0_i32_9 = arith.constant 0 : i32
    %14 = tpu.memref_slice %arg2[%c1_i32_7, %1, %c0_i32_9] : memref<2x2x128xf32, #tpu.memory_space<any>> -> memref<1x2x128xf32, #tpu.memory_space<any>>
    %15 = tpu.memref_squeeze %14 : memref<1x2x128xf32, #tpu.memory_space<any>> -> memref<2x128xf32, #tpu.memory_space<any>>
    %16 = tpu.memref_slice %arg3[%c1_i32_8] : memref<2x!tpu.dma_semaphore, #tpu.memory_space<semaphore_mem>> -> memref<1x!tpu.dma_semaphore, #tpu.memory_space<semaphore_mem>>
    %17 = tpu.memref_squeeze %16 : memref<1x!tpu.dma_semaphore, #tpu.memory_space<semaphore_mem>> -> memref<!tpu.dma_semaphore, #tpu.memory_space<semaphore_mem>>
    tpu.wait_dma2 semaphore(%17 : memref<!tpu.dma_semaphore, #tpu.memory_space<semaphore_mem>>) src(%arg1 : memref<2x128xf32, #tpu.memory_space<vmem>>) dst(%15 : memref<2x128xf32, #tpu.memory_space<any>>)
    return
  }
  func.func @transform_0(%arg0: i32) -> (i32, i32) {
    %c0_i32 = arith.constant 0 : i32
    %c0_i32_0 = arith.constant 0 : i32
    return %arg0, %c0_i32 : i32, i32
  }
}

</mosaic_0001>

<bundles_post_ra>
// kernel: tpu_custom_call.1
= control target key start
LH: loop header
LB: loop body
LE: loop exit
PB: predicated region body
PF: predicated region fallthrough
CT: control target
= control target key end

     0   :  { %6 = vsyncpa [#allocation4], 0  ;;  %s154_s9 = smov [#allocation3]   ;;  %s174_s0 = inlined_call_operand.hbm [shape: f32[2,128], index: 0, kind: input, shape index: {}]   ;;  %s175_s1 = inlined_call_operand.hbm [shape: f32[2,2,128], index: 1, kind: output, shape index: {}]  }
   0x1   :  { %s12_s8 = sshll.u32 %s174_s0, 4  ;;  %s14_s10 = sshll.u32 %s154_s9, 4  ;;  %s13_s8 = int_to_ptr.hbm [resolvable:$true] %s12_s8  ;;  %s15_s10 = int_to_ptr.vmem [resolvable:$true] %s14_s10 }
   0x2   :  { %17 = dma.hbm_to_vmem [thread:$0]  %s13_s8, 32, %s15_s10, [#allocation4]  }
   0x3   :  { %148 = dma.done.wait [#allocation4], 32  }
   0x4   :  { %149 = vsyncadd [#allocation4], 4294967264  ;;  %s33_s13 = sshll.u32 %s175_s1, 4  ;;  %s72_s16 = scalar_lea.hbm %s175_s1, 2  ;;  %s34_s13 = int_to_ptr.hbm [resolvable:$true] %s33_s13 }
   0x5   :  { %s49_s17 = sshll.u32 %s72_s16, 4  ;;  %s50_s17 = int_to_ptr.hbm [resolvable:$true] %s49_s17 }
   0x6   :  { %36 = dma.vmem_to_hbm [thread:$0]  %s15_s10, 32, %s34_s13, [#allocation2] }
   0x7   :  { %52 = dma.vmem_to_hbm [thread:$0]  %s15_s10, 32, %s50_s17, [#allocation2 + $0x1] }
   0x8   :  { %150 = dma.done.wait [#allocation2], 32 }
   0x9   :  { %151 = vsyncadd [#allocation2], 4294967264 }
   0xa   :  { %152 = dma.done.wait [#allocation2 + $0x1], 32 }
   0xb   :  { %153 = vsyncadd [#allocation2 + $0x1], 4294967264 }
   0xc   :  { %58 = vsyncpa [#allocation4], 1 }
   0xd   :  { %59 = vsyncmov [#allocation2] }
  0x10   :  { %s60_s0 = vpop.sfrf %59 }
  0x11   :  { %p73_p0 = scmp.ne.s32.totalorder %s60_s0, 0 }
  0x13   :  { %64 = shalt.err (%p73_p0)  }
  0x14   :  { %66 = vsyncmov [#allocation2 + $0x1] }
  0x17   :  { %s67_s18 = vpop.sfrf %66 }
  0x18   :  { %p74_p1 = scmp.ne.s32.totalorder %s67_s18, 0 }
  0x1a   :  { %71 = shalt.err (%p74_p1)  }

</bundles_post_ra>
